<compile_context>
chip_gen: v7x
topology: tpu7x:2x2x1
jax: 0.10.0
libtpu: 0.0.40
codegen_flags: <defaults>
</compile_context>

<pallas_src>
import numpy as np
import jax
import jax.numpy as jnp
from jax.experimental import pallas as pl
from jax.experimental.pallas import tpu as pltpu

WIN_LENGTH = 16
HOP_LENGTH = 16
N_FFT = 256
N_FREQ = N_FFT // 2 + 1                      # onesided -> 129
WIN_OFFSET = (N_FFT - WIN_LENGTH) // 2       # torch centers the short window: 120
LEFT_PAD = N_FFT // 2 - WIN_OFFSET           # samples of 'center' padding actually used: 8

assert HOP_LENGTH == WIN_LENGTH, "gather-free contiguous framing requires hop == win"
# TODO(synk): framing below also assumes center=True with constant (zero) padding and
#             a periodic hamming window (the module's defaults).


def _round_up(x, m):
    return -(-x // m) * m


def _make_basis_np():
    # Real-part DFT basis with the window folded in, built once in float64 at import
    # time (phase arguments reach ~400 rad) and cast to f32 for a tight match to torch.
    n = np.arange(WIN_LENGTH, dtype=np.float64)
    window = 0.54 - 0.46 * np.cos(2.0 * np.pi * n / WIN_LENGTH)   # periodic hamming
    j = n + WIN_OFFSET                                            # index inside n_fft frame
    k = np.arange(N_FREQ, dtype=np.float64)
    basis = window[:, None] * np.cos(2.0 * np.pi * j[:, None] * k[None, :] / N_FFT)
    return basis.astype(np.float32)                               # (16, 129)


_BASIS_NP = _make_basis_np()


# ---------------------------------------------------------------------------
# Pallas kernel: one (tm, 16) @ (16, 129) tile per grid step.
# ---------------------------------------------------------------------------
def _stft_matmul_kernel(frames_ref, basis_ref, out_ref):
    out_ref[...] = jnp.dot(
        frames_ref[...], basis_ref[...], preferred_element_type=jnp.float32
    )


def _choose_tiling(m, tm_max=2048):
    # Memory-bound kernel: use the biggest 8-aligned row tile that fits VMEM
    # (amortizes the ~0.35us per-grid-step overhead), but keep >=2 grid steps so
    # both v7x TensorCores get a share under dimension_semantics=("parallel",).
    m8 = _round_up(max(m, 1), 8)
    num_steps = pl.cdiv(m8, tm_max)
    if m8 >= 16:
        num_steps = max(num_steps, 2)
    tm = _round_up(pl.cdiv(m8, num_steps), 8)
    return tm, num_steps, tm * num_steps


def stft_matmul(frames, basis, *, tm_max=2048):
    m, k = frames.shape
    kb, f = basis.shape
    assert k == kb
    tm, num_steps, m_pad = _choose_tiling(m, tm_max)
    if m_pad != m:
        frames = jnp.pad(frames, ((0, m_pad - m), (0, 0)))

    cost = pl.CostEstimate(
        flops=2 * m_pad * k * f,
        transcendentals=0,
        bytes_accessed=4 * (m_pad * k + k * f + m_pad * f),
    )

    out = pl.pallas_call(
        _stft_matmul_kernel,
        out_shape=jax.ShapeDtypeStruct((m_pad, f), jnp.float32),
        grid_spec=pltpu.PrefetchScalarGridSpec(
            num_scalar_prefetch=0,
            grid=(num_steps,),
            in_specs=[
                pl.BlockSpec((tm, k), lambda i: (i, 0)),   # frames row tile (pipelined)
                pl.BlockSpec((k, f), lambda i: (0, 0)),    # basis, resident across grid
            ],
            out_specs=pl.BlockSpec((tm, f), lambda i: (i, 0)),
        ),
        compiler_params=pltpu.CompilerParams(
            dimension_semantics=("parallel",),
            vmem_limit_bytes=32 * 1024 * 1024,   # headroom over v5e's 16 MiB default
        ),
        cost_estimate=cost,
    )(frames, basis)
    return out[:m] if m_pad != m else out


# ---------------------------------------------------------------------------
# Forward pass (framing / layout glue in plain JAX, matmul via Pallas)
# ---------------------------------------------------------------------------
def _stft_core(x, matmul_fn):
    if x.ndim == 5:
        b, e, t, c, d = x.shape
        lead = (b, e, t)
    else:
        b, t, c, d = x.shape
        lead = (b, t)
    n_frames = 1 + d // HOP_LENGTH
    total = n_frames * WIN_LENGTH

    # Each frame only reaches 8 samples past the signal on either side, so pad just
    # those (not n_fft//2 = 128), then slice/reshape into non-overlapping frames.
    right_pad = max(0, total - d - LEFT_PAD)
    pad_cfg = [(0, 0)] * (x.ndim - 1) + [(LEFT_PAD, right_pad)]
    xp = jnp.pad(x.astype(jnp.float32), pad_cfg)[..., :total]

    frames = xp.reshape(*lead, c, n_frames, WIN_LENGTH)
    # Put channel inside frame so the matmul output is already in the final
    # '... n (c freq)' layout; transposing the 16-wide input is ~8x cheaper than
    # transposing the 129-wide output (XLA fuses pad+transpose into one copy).
    frames = jnp.swapaxes(frames, -3, -2)                # (..., n_frames, c, win)
    frames = frames.reshape(-1, WIN_LENGTH)              # (M, 16)

    basis = jnp.asarray(_BASIS_NP)
    out = matmul_fn(frames, basis)                       # (M, 129)
    return out.reshape(*lead, n_frames, c * N_FREQ)      # free reshape, no transpose


@jax.jit
def stft_forward(x):
    return _stft_core(x, stft_matmul)


@jax.jit
def stft_reference(x):
    # Pure-jnp reference (same math, no Pallas) used for the correctness check.
    return _stft_core(
        x, lambda fr, bmat: jnp.dot(fr, bmat, preferred_element_type=jnp.float32)
    )


# ---------------------------------------------------------------------------
if __name__ == "__main__":
    key = jax.random.PRNGKey(0)
    b, t, c, d = 2, 4, 2, 64
    x = jax.random.normal(key, (b, t, c, d), dtype=jnp.float32)

    y = jax.block_until_ready(stft_forward(x))
    y_ref = jax.block_until_ready(stft_reference(x))

    n_frames = 1 + d // HOP_LENGTH
    assert y.shape == (b, t, n_frames, c * N_FREQ), y.shape
    assert jnp.allclose(y, y_ref, atol=1e-4, rtol=1e-4)

    # 5-D branch of the module's forward: (b, e, t, c, d) -> (b, e, t, n, c*freq).
    x5 = jax.random.normal(jax.random.PRNGKey(1), (2, 3, 2, 2, 32), dtype=jnp.float32)
    y5 = jax.block_until_ready(stft_forward(x5))
    y5_ref = jax.block_until_ready(stft_reference(x5))
    assert y5.shape == (2, 3, 2, 1 + 32 // HOP_LENGTH, 2 * N_FREQ), y5.shape
    assert jnp.allclose(y5, y5_ref, atol=1e-4, rtol=1e-4)

    print("KERNEL_OK")
</pallas_src>

<mosaic_0001>
module attributes {stable_mosaic.version = 11 : i64} {
  func.func @_stft_matmul_kernel(%arg0: i32, %arg1: memref<40x16xf32, #tpu.memory_space<vmem>>, %arg2: memref<16x129xf32, #tpu.memory_space<vmem>>, %arg3: memref<40x129xf32, #tpu.memory_space<vmem>>) attributes {dimension_semantics = [#tpu.dimension_semantics<parallel>], iteration_bounds = array<i64: 2>, scalar_prefetch = 0 : i64, scratch_operands = 0 : i64, tpu.core_type = #tpu.core_type<tc>, window_params = [{transform_indices = @transform_0, window_bounds = array<i64: 40, 16>}, {pipeline_mode = #tpu.pipeline_mode<synchronous>, transform_indices = @transform_1, window_bounds = array<i64: 16, 129>}, {transform_indices = @transform_2, window_bounds = array<i64: 40, 129>}]} {
    %c0 = arith.constant 0 : index
    %c0_0 = arith.constant 0 : index
    %0 = vector.load %arg1[%c0, %c0_0] : memref<40x16xf32, #tpu.memory_space<vmem>>, vector<40x16xf32>
    %c0_1 = arith.constant 0 : index
    %c0_2 = arith.constant 0 : index
    %1 = vector.load %arg2[%c0_1, %c0_2] : memref<16x129xf32, #tpu.memory_space<vmem>>, vector<16x129xf32>
    %cst = arith.constant dense<0.000000e+00> : vector<40x129xf32>
    %2 = tpu.matmul %0, %1, %cst {dimension_numbers = #tpu.dot_dimension_numbers<[1], [0], [0], [1], [0, 0, 1, 1], [], []>} : vector<40x16xf32>, vector<16x129xf32>, vector<40x129xf32> -> vector<40x129xf32>
    %c0_3 = arith.constant 0 : index
    %c0_4 = arith.constant 0 : index
    %3 = vector.load %arg3[%c0_3, %c0_4] : memref<40x129xf32, #tpu.memory_space<vmem>>, vector<40x129xf32>
    tpu.vector_store %arg3[%c0_3, %c0_4], %2 {strides = array<i32>} : memref<40x129xf32, #tpu.memory_space<vmem>>, vector<40x129xf32>,
    return
  }
  func.func @transform_0(%arg0: i32) -> (i32, i32) {
    %c0_i32 = arith.constant 0 : i32
    %c0_i32_0 = arith.constant 0 : i32
    return %arg0, %c0_i32 : i32, i32
  }
  func.func @transform_1(%arg0: i32) -> (i32, i32) {
    %c0_i32 = arith.constant 0 : i32
    %c0_i32_0 = arith.constant 0 : i32
    %c0_i32_1 = arith.constant 0 : i32
    return %c0_i32, %c0_i32_0 : i32, i32
  }
  func.func @transform_2(%arg0: i32) -> (i32, i32) {
    %c0_i32 = arith.constant 0 : i32
    %c0_i32_0 = arith.constant 0 : i32
    return %arg0, %c0_i32 : i32, i32
  }
}

</mosaic_0001>

<bundles_post_ra>
// kernel: stft_forward.1
= control target key start
LH: loop header
LB: loop body
LE: loop exit
PB: predicated region body
PF: predicated region fallthrough
CT: control target
= control target key end

     0   :  { %s393_s9 = smov 0   ;;  %s427_s0 = inlined_call_operand.vmem [shape: f32[80,16], index: 0, kind: input, shape index: {}]   ;;  %s428_s1 = inlined_call_operand.vmem [shape: f32[16,129], index: 1, kind: input, shape index: {}]   ;;  %s429_s2 = inlined_call_operand.vmem [shape: f32[80,129], index: 2, kind: output, shape index: {}]  }
   0x1 LB: > { %s338_s10 = sadd.s32 4294967295, %s375_s9   ;;  %p342_p0 = scmp.ge.s32.totalorder %s375_s9, 1  ;;  %s375_s9 = sphi %s393_s9, %s12_s9  }
   0x2   : > { %p113_p1 = scmp.lt.s32.totalorder %s375_s9, 3 }
   0x4   : > { %p114_p2 = pnand %p342_p0, %p113_p1 }
   0x5   : > { %v155_v0 = vld [vmem:[%s428_s1 + $0x8] sm:$0xff] (!%p114_p2)  ;;  %v157_v1 = vld [vmem:[%s428_s1 + $0x18] sm:$0xff] (!%p114_p2)  ;;  %v154_v2 = vld [vmem:[%s428_s1] sm:$0xff] (!%p114_p2)  ;;  %s136_s17 = smul.u32 (!%p114_p2), 5, %s338_s10  ;;  %v377_v5 = vmov (!%p114_p2), 0.0   ;;  %vm158_vm0 = vcmask (!%p114_p2), 130048  }
   0x6   : > { %117 = sbr.rel (%p114_p2) target bundleno = 239 (0xef), region = 28  ;;  %v354_v3 = vpack.c.bf16 (!%p114_p2), %v157_v1, %v155_v0  ;;  %v156_v4 = vld [vmem:[%s428_s1 + $0x10] sm:$0xff] (!%p114_p2)  ;;  %238 = vmatprep.mubr.f32.mxu0 (!%p114_p2), %v377_v5  ;;  %256 = vmatprep.mubr.f32.mxu1 (!%p114_p2), %v377_v5  ;;  %vm270_vm1 = vcmask (!%p114_p2), 7168  }
   0x7   : > { %v356_v6 = vpack.c.bf16 (!%p114_p2), %v156_v4, %v154_v2  ;;  %p137_p3 = scmp.lt.s32.totalorder (!%p114_p2), %s136_s17, 9 }
   0x8   : > { %355 = vmatprep.subr.bf16.mxu0 (!%p114_p2), %v354_v3  ;;  %358 = vmatprep.subr.bf16.mxu1 (!%p114_p2), %v354_v3 }
   0x9   : > { %357 = vmatpush1.bf16.msra.mxu0 (!%p114_p2), %v356_v6  ;;  %359 = vmatpush1.bf16.msra.mxu1 (!%p114_p2), %v356_v6 }
   0xd   : > { %s431_s17 = smov (!%p137_p3, %s136_s17), 9 }
   0xe   : > { %s343_s20 = sshll.u32 %s431_s17, 3  ;;  %s353_s24 = sshll.u32 %s431_s17, 4 }
   0xf   : > { %s140_s23 = scalar_lea.vmem %s427_s0, %s343_s20  ;;  %s147_s27 = scalar_lea.vmem %s429_s2, %s353_s24 }
  0x10   : > { %v149_v7 = vld [vmem:[%s140_s23] sm:$0xff]  ;;  %v152_v8 = vld [vmem:[%s140_s23 + $0x18] sm:$0xff]  ;;  %v150_v9 = vld [vmem:[%s140_s23 + $0x8] sm:$0xff] }
  0x11   : > { %346 = vmatmul.mubr.msk.f32.vlgmr.msra.gmra.mrb[0].mxu0 %vm158_vm0, %v149_v7  ;;  %349 = vmatmul.mubr.msk.f32.vlgmr.msra.gmra.mrb[0].mxu1 %vm158_vm0, %v152_v8  ;;  %v153_v10 = vld [vmem:[%s140_s23 + $0x20] sm:$0xff]  ;;  %v151_v11 = vld [vmem:[%s140_s23 + $0x10] sm:$0xff] }
  0x12   : > { %244 = vmatprep.mubr.f32.mxu0 %v377_v5  ;;  %262 = vmatprep.mubr.f32.mxu1 %v377_v5 }
  0x15   : > { %347 = vmatmul.mubr.msk.f32.gmra.mrb[2].mxu0 %vm158_vm0, %v150_v9  ;;  %350 = vmatmul.mubr.msk.f32.gmra.mrb[2].mxu1 %vm158_vm0, %v153_v10 }
  0x16   : > { %250 = vmatprep.mubr.f32.mxu0 %v377_v5 }
  0x19   : > { %348 = vmatmul.mubr.msk.f32.gmra.mrb[4].mxu0 %vm158_vm0, %v151_v11 }
  0xe4   : > { %v240_v12 = vpop.f32.mrb[0].mxu0  ;;  %v258_v13 = vpop.f32.mrb[0].mxu1 }
  0xe5   : > { %269 = vst [vmem:[%s147_s27] sm:$0xff] %v240_v12  ;;  %v242_v14 = vpop.f32.mrb[1].mxu0  ;;  %276 = vst [vmem:[%s147_s27 + $0x30] sm:$0xff] %v258_v13  ;;  %v260_v15 = vpop.f32.mrb[1].mxu1 }
  0xe6   : > { %271 = vst.msk [vmem:[%s147_s27 + $0x8] sm:$0xff] %vm270_vm1, %v242_v14  ;;  %277 = vst.msk [vmem:[%s147_s27 + $0x38] sm:$0xff] %vm270_vm1, %v260_v15 }
  0xe8   : > { %v246_v16 = vpop.f32.mrb[2].mxu0  ;;  %v264_v17 = vpop.f32.mrb[2].mxu1 }
  0xe9   : > { %272 = vst [vmem:[%s147_s27 + $0x10] sm:$0xff] %v246_v16  ;;  %v248_v18 = vpop.f32.mrb[3].mxu0  ;;  %278 = vst [vmem:[%s147_s27 + $0x40] sm:$0xff] %v264_v17  ;;  %v266_v19 = vpop.f32.mrb[3].mxu1 }
  0xea   : > { %273 = vst.msk [vmem:[%s147_s27 + $0x18] sm:$0xff] %vm270_vm1, %v248_v18  ;;  %279 = vst.msk [vmem:[%s147_s27 + $0x48] sm:$0xff] %vm270_vm1, %v266_v19 }
  0xec   : > { %v252_v20 = vpop.f32.mrb[4].mxu0 }
  0xed   : > { %274 = vst [vmem:[%s147_s27 + $0x20] sm:$0xff] %v252_v20  ;;  %v254_v21 = vpop.f32.mrb[5].mxu0 }
  0xee   : > { %275 = vst.msk [vmem:[%s147_s27 + $0x28] sm:$0xff] %vm270_vm1, %v254_v21 }
  0xef PF: > { %s12_s9 = sadd.s32 1, %s375_s9  }
  0xf0   : > { %p9_p4 = scmp.ge.s32.totalorder %s12_s9, 4  }
  0xf2   :  { %11 = sbr.rel (!%p9_p4) target bundleno = 1 (0x1), region = 58 }

</bundles_post_ra>
